<compile_context>
chip_gen: v7x
topology: tpu7x:2x2x1
jax: 0.10.0
libtpu: 0.0.40
codegen_flags: <defaults>
</compile_context>

<pallas_src>
import jax
import jax.numpy as jnp
from jax import lax
from jax.experimental import pallas as pl
from jax.experimental.pallas import tpu as pltpu

_MIB = 1024 * 1024
_LANES = 128
_TARGET_STEP_ELEMS = 1 << 20   # ~1M elems per input per grid step (4 MiB f32)


def _vmem_capacity_bytes() -> int:
    try:
        cap = int(pltpu.get_tpu_info().vmem_capacity_bytes)
    except Exception:
        cap = 64 * _MIB          # conservative (v7x-sized) fallback
    return max(32 * _MIB, min(cap, 256 * _MIB))


def _make_kernel(block_t, acc_w, steps_per_chunk, hw, ragged):
    n_sub = block_t // acc_w

    def kernel(yhat_ref, gt_ref, mask_ref, num_ref, den_ref):
        st = pl.program_id(2)

        @pl.when(st == 0)
        def _init():
            num_ref[...] = jnp.zeros_like(num_ref)
            den_ref[...] = jnp.zeros_like(den_ref)

        # Stream native dtype; cast to f32 in vregs (halves HBM bytes for bf16).
        y = yhat_ref[...].astype(jnp.float32)   # (R, block_t)
        g = gt_ref[...].astype(jnp.float32)
        m = mask_ref[...].astype(jnp.float32)
        d = y - g

        if ragged:
            # Zero contributions past the flat spatial extent (ragged last
            # block and clamped "phantom" steps from the chunk split).
            ch = pl.program_id(1)
            col0 = (ch * steps_per_chunk + st) * block_t
            limit = hw - col0                     # <= 0 for phantom steps
            idx = lax.broadcasted_iota(jnp.int32, d.shape, 1)
            valid = idx < limit
            d = jnp.where(valid, d, 0.0)
            m = jnp.where(valid, m, 0.0)

        val = jnp.abs(d * m)

        # Pure VALU accumulation into lane-dense (R, acc_w) partials; no XLU,
        # no relayout (128-aligned static lane slices pick whole vreg tiles).
        num = num_ref[...]
        den = den_ref[...]
        for j in range(n_sub):
            sl = slice(j * acc_w, (j + 1) * acc_w)
            num = num + val[:, sl]
            den = den + m[:, sl]
        num_ref[...] = num
        den_ref[...] = den

    return kernel


def traloss0_forward(yhat, gtruth, mask):
    """yhat, gtruth, mask: (N, C, H, W)  ->  (C,) float32"""
    N, C, H, W = yhat.shape
    NC = N * C
    HW = H * W

    # Free, contiguous reshapes: no HBM copy, no pad, no upcast.
    y2 = yhat.reshape(NC, HW)
    g2 = gtruth.reshape(NC, HW)
    m2 = mask.reshape(NC, HW)

    # ---- per-generation VMEM budget --------------------------------------
    vmem_cap = _vmem_capacity_bytes()
    input_budget = (vmem_cap * 5) // 8            # 3 inputs x 2 buffers
    bytes3 = (int(y2.dtype.itemsize) + int(g2.dtype.itemsize)
              + int(m2.dtype.itemsize))
    max_block_elems = max(1024, input_budget // (2 * bytes3))

    # ---- rows (= independent (n, c) reductions) per block ----------------
    r_cap = max(8, min(1024, ((max_block_elems // _LANES) // 8) * 8))
    R = NC if NC <= r_cap else r_cap              # full dim or multiple of 8
    n_row_blocks = pl.cdiv(NC, R)
    NC_pad = n_row_blocks * R

    # ---- spatial tiling (flat HW, 128-lane columns) -----------------------
    s_cols = pl.cdiv(HW, _LANES)
    if HW % _LANES == 0:
        max_cols = s_cols
        acc_w = _LANES
    elif s_cols == 1:                             # HW < 128: one full-dim block
        max_cols = 1
        acc_w = HW
    else:
        max_cols = s_cols - 1                     # keep all block starts in bounds
        acc_w = _LANES

    if acc_w == _LANES:
        unroll_cap = 256 if R >= 8 else 512
        t_cols = max(1, min(max_cols,
                            max_block_elems // (R * _LANES),
                            unroll_cap,
                            max(1, _TARGET_STEP_ELEMS // (R * _LANES))))
        block_t = t_cols * _LANES
        n_steps_total = pl.cdiv(s_cols, t_cols)
    else:
        block_t = HW
        n_steps_total = 1

    # ---- split spatial steps into (parallel chunks) x (arbitrary steps) so
    #      v7x's second TensorCore gets work even when n_row_blocks == 1. ----
    n_chunks = 2 if (n_row_blocks == 1 and n_steps_total >= 2) else 1
    steps_per_chunk = pl.cdiv(n_steps_total, n_chunks)
    n_chunks = pl.cdiv(n_steps_total, steps_per_chunk)

    ragged = (n_chunks * steps_per_chunk * block_t) != HW

    def in_index_map(rb, ch, st):
        # Clamp phantom steps (chunk-split remainder) onto the last real
        # block; the in-kernel iota mask zeroes their contribution.
        col = ch * steps_per_chunk + st
        col = jnp.minimum(col, n_steps_total - 1)
        return (rb, col)

    in_spec = pl.BlockSpec((R, block_t), in_index_map)
    out_spec = pl.BlockSpec((R, acc_w), lambda rb, ch, st: (rb, ch))

    vmem_limit = int(min(vmem_cap - 2 * _MIB, input_budget + 24 * _MIB))

    kernel = _make_kernel(block_t, acc_w, steps_per_chunk, HW, ragged)

    num_out, den_out = pl.pallas_call(
        kernel,
        out_shape=(
            jax.ShapeDtypeStruct((NC_pad, n_chunks * acc_w), jnp.float32),
            jax.ShapeDtypeStruct((NC_pad, n_chunks * acc_w), jnp.float32),
        ),
        grid_spec=pltpu.PrefetchScalarGridSpec(
            num_scalar_prefetch=0,
            grid=(n_row_blocks, n_chunks, steps_per_chunk),
            in_specs=[in_spec, in_spec, in_spec],
            out_specs=(out_spec, out_spec),
        ),
        compiler_params=pltpu.CompilerParams(
            dimension_semantics=("parallel", "parallel", "arbitrary"),
            vmem_limit_bytes=vmem_limit,
        ),
    )(y2, g2, m2)

    # Tiny XLA epilogue: combine per-chunk / per-lane partials, divide, mean.
    # (Padded rows >= NC hold garbage from clamped edge blocks and are sliced
    # away before any cross-row op.)
    num = jnp.sum(num_out[:NC], axis=1)           # (NC,)
    den = jnp.sum(den_out[:NC], axis=1)           # (NC,) == predot
    ans = (num / den).reshape(N, C)               # div-by-0 -> inf/nan, as in torch
    return jnp.mean(ans, axis=0)                  # (C,)


def _reference(yhat, gtruth, mask):
    y = yhat * mask
    g = gtruth * mask
    predot = jnp.sum(mask, axis=(2, 3))
    ans = jnp.sum(jnp.abs(y - g), axis=(2, 3)) / predot
    return jnp.mean(ans, axis=0)


if __name__ == "__main__":
    key = jax.random.PRNGKey(0)
    k1, k2, k3 = jax.random.split(key, 3)

    N, C, H, W = 2, 4, 16, 16
    yhat = jax.random.normal(k1, (N, C, H, W), dtype=jnp.float32)
    gtruth = jax.random.normal(k2, (N, C, H, W), dtype=jnp.float32)
    # binary-ish mask (nonzero sums per (n, c) so the division is well-defined)
    mask = (jax.random.uniform(k3, (N, C, H, W)) > 0.3).astype(jnp.float32)

    out = traloss0_forward(yhat, gtruth, mask)
    out = jax.block_until_ready(out)

    ref = _reference(yhat, gtruth, mask)
    assert out.shape == (C,)
    assert jnp.allclose(out, ref, atol=1e-5, rtol=1e-5), (out, ref)

    print("KERNEL_OK")
</pallas_src>

<mosaic_0001>
module attributes {stable_mosaic.version = 11 : i64} {
  func.func @kernel(%arg0: i32, %arg1: i32, %arg2: i32, %arg3: memref<8x256xf32, #tpu.memory_space<vmem>>, %arg4: memref<8x256xf32, #tpu.memory_space<vmem>>, %arg5: memref<8x256xf32, #tpu.memory_space<vmem>>, %arg6: memref<8x128xf32, #tpu.memory_space<vmem>>, %arg7: memref<8x128xf32, #tpu.memory_space<vmem>>) attributes {dimension_semantics = [#tpu.dimension_semantics<parallel>, #tpu.dimension_semantics<parallel>, #tpu.dimension_semantics<arbitrary>], iteration_bounds = array<i64: 1, 1, 1>, scalar_prefetch = 0 : i64, scratch_operands = 0 : i64, tpu.core_type = #tpu.core_type<tc>, window_params = [{transform_indices = @transform_0, window_bounds = array<i64: 8, 256>}, {transform_indices = @transform_1, window_bounds = array<i64: 8, 256>}, {transform_indices = @transform_2, window_bounds = array<i64: 8, 256>}, {transform_indices = @transform_3, window_bounds = array<i64: 8, 128>}, {transform_indices = @transform_4, window_bounds = array<i64: 8, 128>}]} {
    %c0_i32 = arith.constant 0 : i32
    %0 = arith.cmpi eq, %arg2, %c0_i32 : i32
    %1 = arith.extui %0 : i1 to i32
    %c0_i32_0 = arith.constant 0 : i32
    %2 = arith.cmpi ne, %1, %c0_i32_0 : i32
    scf.if %2 {
      %cst = arith.constant 0.000000e+00 : f32
      %21 = vector.broadcast %cst : f32 to vector<8x128xf32>
      %c0_14 = arith.constant 0 : index
      %c0_15 = arith.constant 0 : index
      %22 = vector.load %arg6[%c0_14, %c0_15] : memref<8x128xf32, #tpu.memory_space<vmem>>, vector<8x128xf32>
      tpu.vector_store %arg6[%c0_14, %c0_15], %21 {strides = array<i32>} : memref<8x128xf32, #tpu.memory_space<vmem>>, vector<8x128xf32>,
      %cst_16 = arith.constant 0.000000e+00 : f32
      %23 = vector.broadcast %cst_16 : f32 to vector<8x128xf32>
      %c0_17 = arith.constant 0 : index
      %c0_18 = arith.constant 0 : index
      %24 = vector.load %arg7[%c0_17, %c0_18] : memref<8x128xf32, #tpu.memory_space<vmem>>, vector<8x128xf32>
      tpu.vector_store %arg7[%c0_17, %c0_18], %23 {strides = array<i32>} : memref<8x128xf32, #tpu.memory_space<vmem>>, vector<8x128xf32>,
    } else {
    }
    %c0 = arith.constant 0 : index
    %c0_1 = arith.constant 0 : index
    %3 = vector.load %arg3[%c0, %c0_1] : memref<8x256xf32, #tpu.memory_space<vmem>>, vector<8x256xf32>
    %c0_2 = arith.constant 0 : index
    %c0_3 = arith.constant 0 : index
    %4 = vector.load %arg4[%c0_2, %c0_3] : memref<8x256xf32, #tpu.memory_space<vmem>>, vector<8x256xf32>
    %c0_4 = arith.constant 0 : index
    %c0_5 = arith.constant 0 : index
    %5 = vector.load %arg5[%c0_4, %c0_5] : memref<8x256xf32, #tpu.memory_space<vmem>>, vector<8x256xf32>
    %6 = arith.subf %3, %4 : vector<8x256xf32>
    %7 = arith.mulf %6, %5 : vector<8x256xf32>
    %8 = math.absf %7 : vector<8x256xf32>
    %c0_6 = arith.constant 0 : index
    %c0_7 = arith.constant 0 : index
    %9 = vector.load %arg6[%c0_6, %c0_7] : memref<8x128xf32, #tpu.memory_space<vmem>>, vector<8x128xf32>
    %c0_8 = arith.constant 0 : index
    %c0_9 = arith.constant 0 : index
    %10 = vector.load %arg7[%c0_8, %c0_9] : memref<8x128xf32, #tpu.memory_space<vmem>>, vector<8x128xf32>
    %11 = vector.extract_strided_slice %8 {offsets = [0, 0], sizes = [8, 128], strides = [1, 1]} : vector<8x256xf32> to vector<8x128xf32>
    %12 = arith.addf %9, %11 : vector<8x128xf32>
    %13 = vector.extract_strided_slice %5 {offsets = [0, 0], sizes = [8, 128], strides = [1, 1]} : vector<8x256xf32> to vector<8x128xf32>
    %14 = arith.addf %10, %13 : vector<8x128xf32>
    %15 = vector.extract_strided_slice %8 {offsets = [0, 128], sizes = [8, 128], strides = [1, 1]} : vector<8x256xf32> to vector<8x128xf32>
    %16 = arith.addf %12, %15 : vector<8x128xf32>
    %17 = vector.extract_strided_slice %5 {offsets = [0, 128], sizes = [8, 128], strides = [1, 1]} : vector<8x256xf32> to vector<8x128xf32>
    %18 = arith.addf %14, %17 : vector<8x128xf32>
    %c0_10 = arith.constant 0 : index
    %c0_11 = arith.constant 0 : index
    %19 = vector.load %arg6[%c0_10, %c0_11] : memref<8x128xf32, #tpu.memory_space<vmem>>, vector<8x128xf32>
    tpu.vector_store %arg6[%c0_10, %c0_11], %16 {strides = array<i32>} : memref<8x128xf32, #tpu.memory_space<vmem>>, vector<8x128xf32>,
    %c0_12 = arith.constant 0 : index
    %c0_13 = arith.constant 0 : index
    %20 = vector.load %arg7[%c0_12, %c0_13] : memref<8x128xf32, #tpu.memory_space<vmem>>, vector<8x128xf32>
    tpu.vector_store %arg7[%c0_12, %c0_13], %18 {strides = array<i32>} : memref<8x128xf32, #tpu.memory_space<vmem>>, vector<8x128xf32>,
    return
  }
  func.func @transform_0(%arg0: i32, %arg1: i32, %arg2: i32) -> (i32, i32) {
    %c1_i32 = arith.constant 1 : i32
    %0 = arith.muli %arg1, %c1_i32 : i32
    %1 = arith.addi %0, %arg2 : i32
    %c0_i32 = arith.constant 0 : i32
    %2 = arith.minsi %1, %c0_i32 : i32
    %c0_i32_0 = arith.constant 0 : i32
    return %arg0, %2 : i32, i32
  }
  func.func @transform_1(%arg0: i32, %arg1: i32, %arg2: i32) -> (i32, i32) {
    %c1_i32 = arith.constant 1 : i32
    %0 = arith.muli %arg1, %c1_i32 : i32
    %1 = arith.addi %0, %arg2 : i32
    %c0_i32 = arith.constant 0 : i32
    %2 = arith.minsi %1, %c0_i32 : i32
    %c0_i32_0 = arith.constant 0 : i32
    return %arg0, %2 : i32, i32
  }
  func.func @transform_2(%arg0: i32, %arg1: i32, %arg2: i32) -> (i32, i32) {
    %c1_i32 = arith.constant 1 : i32
    %0 = arith.muli %arg1, %c1_i32 : i32
    %1 = arith.addi %0, %arg2 : i32
    %c0_i32 = arith.constant 0 : i32
    %2 = arith.minsi %1, %c0_i32 : i32
    %c0_i32_0 = arith.constant 0 : i32
    return %arg0, %2 : i32, i32
  }
  func.func @transform_3(%arg0: i32, %arg1: i32, %arg2: i32) -> (i32, i32) {
    %c0_i32 = arith.constant 0 : i32
    return %arg0, %arg1 : i32, i32
  }
  func.func @transform_4(%arg0: i32, %arg1: i32, %arg2: i32) -> (i32, i32) {
    %c0_i32 = arith.constant 0 : i32
    return %arg0, %arg1 : i32, i32
  }
}

</mosaic_0001>

<bundles_post_ra>
// kernel: tpu_custom_call.1
= control target key start
LH: loop header
LB: loop body
LE: loop exit
PB: predicated region body
PF: predicated region fallthrough
CT: control target
= control target key end

     0   :  { %10 = vsyncpa [#allocation3], 0  ;;  %s359_s0 = inlined_call_operand.hbm [shape: f32[8,256], index: 0, kind: input, shape index: {}]   ;;  %s360_s1 = inlined_call_operand.hbm [shape: f32[8,256], index: 1, kind: input, shape index: {}]   ;;  %s361_s2 = inlined_call_operand.hbm [shape: f32[8,256], index: 2, kind: input, shape index: {}]   ;;  %s362_s3 = inlined_call_operand.hbm [shape: f32[8,128], index: 3, kind: output, shape index: {0}]   ;;  %s363_s4 = inlined_call_operand.hbm [shape: f32[8,128], index: 4, kind: output, shape index: {1}]  }
   0x1   :  { %11 = vsyncpa [#allocation6], 0 }
   0x2   :  { %12 = vsyncpa [#allocation4], 0 }
   0x3   :  { %13 = vsyncpa [#allocation10], 0  ;;  %s269_s15 = smov [#allocation5]   ;;  %s270_s17 = smov [#allocation2]  }
   0x4   :  { %s42_s16 = sshll.u32 %s269_s15, 4  ;;  %s26_s18 = sshll.u32 %s270_s17, 4  ;;  %s43_s16 = int_to_ptr.vmem [resolvable:$true] %s42_s16  ;;  %s27_s18 = int_to_ptr.vmem [resolvable:$true] %s26_s18 }
   0x5   :  { %s151_s21 = scalar_lea.hbm %s360_s1, 256 }
   0x6   :  { %p152_p0 = scmp.ne.s32.totalorder %s360_s1, %s151_s21  ;;  %p155_p1 = scmp.lt.u32.totalorder %s151_s21, %s360_s1 }
   0x8   :  { %p157_p2 = pnand %p155_p1, %p152_p0 }
   0xa   :  { %160 = shalt.err (!%p157_p2)
}
   0xb   :  { %s161_s26 = scalar_lea.vmem %s43_s16, 256  ;;  %p166_p4 = scmp.lt.s32.totalorder %s43_s16, %s43_s16 }
   0xc   :  { %p162_p3 = scmp.ne.s32.totalorder %s43_s16, %s161_s26  ;;  %p167_p5 = scmp.lt.s32.totalorder %s161_s26, %s161_s26 }
   0xe   :  { %p168_p6 = por %p167_p5, %p166_p4 }
  0x10   :  { %p169_p7 = pnand %p168_p6, %p162_p3 }
  0x12   :  { %172 = shalt.err (!%p169_p7)
}
  0x13   :  { %45 = dma.hbm_to_vmem [thread:$0]  %s360_s1, 256, %s43_s16, [#allocation6]  }
  0x14   :  { %s173_s5 = scalar_lea.hbm %s359_s0, 256 }
  0x15   :  { %p174_p8 = scmp.ne.s32.totalorder %s359_s0, %s173_s5  ;;  %p177_p9 = scmp.lt.u32.totalorder %s173_s5, %s359_s0 }
  0x17   :  { %p179_p10 = pnand %p177_p9, %p174_p8 }
  0x19   :  { %182 = shalt.err (!%p179_p10)
}
  0x1a   :  { %s183_s10 = scalar_lea.vmem %s27_s18, 256  ;;  %p188_p12 = scmp.lt.s32.totalorder %s27_s18, %s27_s18 }
  0x1b   :  { %p184_p11 = scmp.ne.s32.totalorder %s27_s18, %s183_s10  ;;  %p189_p13 = scmp.lt.s32.totalorder %s183_s10, %s183_s10 }
  0x1d   :  { %p190_p0 = por %p189_p13, %p188_p12 }
  0x1f   :  { %p191_p1 = pnand %p190_p0, %p184_p11 }
  0x21   :  { %194 = shalt.err (!%p191_p1)
}
  0x22   :  { %29 = dma.hbm_to_vmem [thread:$0]  %s359_s0, 256, %s27_s18, [#allocation3]  }
  0x23   :  { %s271_s12 = smov [#allocation7]   ;;  %s195_s16 = scalar_lea.hbm %s361_s2, 256 }
  0x24   :  { %s58_s13 = sshll.u32 %s271_s12, 4  ;;  %p196_p2 = scmp.ne.s32.totalorder %s361_s2, %s195_s16  ;;  %s59_s13 = int_to_ptr.vmem [resolvable:$true] %s58_s13 }
  0x25   :  { %p199_p3 = scmp.lt.u32.totalorder %s195_s16, %s361_s2 }
  0x27   :  { %p201_p4 = pnand %p199_p3, %p196_p2 }
  0x29   :  { %204 = shalt.err (!%p201_p4)
}
  0x2a   :  { %s205_s22 = scalar_lea.vmem %s59_s13, 256  ;;  %p210_p6 = scmp.lt.s32.totalorder %s59_s13, %s59_s13 }
  0x2b   :  { %p206_p5 = scmp.ne.s32.totalorder %s59_s13, %s205_s22  ;;  %p211_p7 = scmp.lt.s32.totalorder %s205_s22, %s205_s22 }
  0x2d   :  { %p212_p8 = por %p211_p7, %p210_p6 }
  0x2f   :  { %p213_p9 = pnand %p212_p8, %p206_p5 }
  0x31   :  { %216 = shalt.err (!%p213_p9)
}
  0x32   :  { %61 = dma.hbm_to_vmem [thread:$0]  %s361_s2, 256, %s59_s13, [#allocation6]  }
  0x33   :  { %261 = dma.done.wait [#allocation3], 256  }
  0x34   :  { %262 = vsyncadd [#allocation3], 4294967040 }
  0x35   :  { %263 = dma.done.wait [#allocation6], 512  }
  0x36   :  { %264 = vsyncadd [#allocation6], 4294966784  ;;  %v89_v0 = vld [vmem:[#allocation2] sm:$0xff]  ;;  %v90_v1 = vld [vmem:[#allocation2 + $0x8] sm:$0xff]  ;;  %s272_s23 = smov [#allocation9]   ;;  %s273_s2 = smov [#allocation8]  }
  0x37   :  { %v91_v2 = vld [vmem:[#allocation5] sm:$0xff]  ;;  %v92_v3 = vld [vmem:[#allocation5 + $0x8] sm:$0xff]  ;;  %v93_v4 = vld [vmem:[#allocation7] sm:$0xff]  ;;  %s125_s24 = sshll.u32 %s272_s23, 4  ;;  %s115_s25 = sshll.u32 %s273_s2, 4  ;;  %s126_s24 = int_to_ptr.vmem [resolvable:$true] %s125_s24  ;;  %s116_s25 = int_to_ptr.vmem [resolvable:$true] %s115_s25 }
  0x38   :  { %v94_v5 = vld [vmem:[#allocation7 + $0x8] sm:$0xff]  ;;  %v95_v6 = vsub.f32 %v89_v0, %v91_v2  ;;  %v96_v7 = vsub.f32 %v90_v1, %v92_v3  ;;  %s217_s26 = scalar_lea.vmem %s126_s24, 128  ;;  %p222_p11 = scmp.lt.s32.totalorder %s126_s24, %s126_s24 }
  0x39   :  { %v106_v10 = vadd.f32 %v94_v5, %v93_v4  ;;  %p218_p10 = scmp.ne.s32.totalorder %s126_s24, %s217_s26  ;;  %p223_p12 = scmp.lt.s32.totalorder %s217_s26, %s217_s26 }
  0x3a   :  { %v97_v8 = vmul.f32 %v95_v6, %v93_v4  ;;  %v98_v9 = vmul.f32 %v96_v7, %v94_v5 }
  0x3b   :  { %108 = vst [vmem:[#allocation9] sm:$0xff] %v106_v10  ;;  %p224_p13 = por %p223_p12, %p222_p11 }
  0x3c   :  { %v99_v11 = vand.u32 2147483647, %v97_v8  ;;  %v100_v12 = vand.u32 2147483647, %v98_v9 }
  0x3d   :  { %p225_p0 = pnand %p224_p13, %p218_p10 }
  0x3f   :  { %228 = shalt.err (!%p225_p0)
}
  0x40   :  { %s229_s29 = scalar_lea.hbm %s363_s4, 128 }
  0x41   :  { %p230_p1 = scmp.ne.s32.totalorder %s363_s4, %s229_s29  ;;  %p233_p2 = scmp.lt.u32.totalorder %s229_s29, %s363_s4 }
  0x43   :  { %p235_p3 = pnand %p233_p2, %p230_p1 }
  0x45   :  { %238 = shalt.err (!%p235_p3)
}
  0x46   :  { %128 = dma.vmem_to_hbm [thread:$0]  %s126_s24, 128, %s363_s4, [#allocation10]   ;;  %v105_v13 = vadd.f32 %v100_v12, %v99_v11 }
  0x47   :  { %s239_s10 = scalar_lea.vmem %s116_s25, 128  ;;  %p244_p5 = scmp.lt.s32.totalorder %s116_s25, %s116_s25 }
  0x48   :  { %107 = vst [vmem:[#allocation8] sm:$0xff] %v105_v13  ;;  %p240_p4 = scmp.ne.s32.totalorder %s116_s25, %s239_s10  ;;  %p245_p6 = scmp.lt.s32.totalorder %s239_s10, %s239_s10 }
  0x4a   :  { %p246_p7 = por %p245_p6, %p244_p5 }
  0x4c   :  { %p247_p8 = pnand %p246_p7, %p240_p4 }
  0x4e   :  { %250 = shalt.err (!%p247_p8)
}
  0x4f   :  { %s251_s12 = scalar_lea.hbm %s362_s3, 128 }
  0x50   :  { %p252_p9 = scmp.ne.s32.totalorder %s362_s3, %s251_s12  ;;  %p255_p10 = scmp.lt.u32.totalorder %s251_s12, %s362_s3 }
  0x52   :  { %p257_p11 = pnand %p255_p10, %p252_p9 }
  0x54   :  { %260 = shalt.err (!%p257_p11)
}
  0x55   :  { %118 = dma.vmem_to_hbm [thread:$0]  %s116_s25, 128, %s362_s3, [#allocation4]  }
  0x56   :  { %265 = dma.done.wait [#allocation4], 128  }
  0x57   :  { %266 = vsyncadd [#allocation4], 4294967168 }
  0x58   :  { %267 = dma.done.wait [#allocation10], 128  }
  0x59   :  { %268 = vsyncadd [#allocation10], 4294967168 }
  0x5a   :  { %135 = vsyncpa [#allocation3], 1 }
  0x5b   :  { %136 = vsyncpa [#allocation6], 1 }
  0x5c   :  { %137 = vsyncpa [#allocation4], 1 }
  0x5d   :  { %138 = vsyncpa [#allocation10], 1 }

</bundles_post_ra>
